<compile_context>
chip_gen: v6e
topology: v6e:2x2x1
jax: 0.10.0
libtpu: 0.0.40
codegen_flags: <defaults>
</compile_context>

<pallas_src>
import functools

import jax
import jax.numpy as jnp
from jax.experimental import pallas as pl
from jax.experimental.pallas import tpu as pltpu


def _round_up(x: int, m: int) -> int:
    return (x + m - 1) // m * m


# --------------------------------------------------------------------------
# Kernels
# --------------------------------------------------------------------------
def _linear_kernel_small(x_ref, w_ref, b_ref, o_ref):
    # Whole problem in one VMEM block; f32 throughout (tiny shapes).
    o_ref[...] = (
        jnp.dot(x_ref[...], w_ref[...], preferred_element_type=jnp.float32)
        + b_ref[...]
    ).astype(o_ref.dtype)


def _linear_kernel_f32_out(x_ref, w_ref, b_ref, o_ref):
    # x_ref: [TM, TK] bf16 | w_ref: [TK, TN] bf16 ([F, I] layout, no transpose)
    # b_ref: [1, TN]  f32  | o_ref: [TM, TN] f32 (doubles as the accumulator;
    # its BlockSpec index is independent of k, so the block stays resident).
    k = pl.program_id(2)

    @pl.when(k == 0)
    def _():
        o_ref[...] = jnp.zeros_like(o_ref)

    o_ref[...] += jnp.dot(
        x_ref[...], w_ref[...], preferred_element_type=jnp.float32
    )

    @pl.when(k == pl.num_programs(2) - 1)
    def _():
        o_ref[...] += b_ref[...]


def _linear_kernel_acc(x_ref, w_ref, b_ref, o_ref, acc_ref):
    # Same as above, but with an explicit f32 scratch accumulator for output
    # dtypes narrower than f32 (e.g. bf16 activations in -> bf16 out).
    k = pl.program_id(2)

    @pl.when(k == 0)
    def _():
        acc_ref[...] = jnp.zeros_like(acc_ref)

    acc_ref[...] += jnp.dot(
        x_ref[...], w_ref[...], preferred_element_type=jnp.float32
    )

    @pl.when(k == pl.num_programs(2) - 1)
    def _():
        o_ref[...] = (acc_ref[...] + b_ref[...]).astype(o_ref.dtype)


# --------------------------------------------------------------------------
# Module wrapper (parameter prep is one-time, NOT in the per-call path)
# --------------------------------------------------------------------------
class PallasLinear:
    """Pallas equivalent of nn.Linear(num_feat, num_item): y = x @ W.T + b."""

    # Per-generation tile / VMEM-budget table (bf16 operands, f32 accumulate).
    _TILE_TABLE = {
        # v5e / v6e: 128 MiB physical VMEM
        "large_vmem": dict(tm=512, tn=1024, tk=1024, vmem_limit=96 * 1024 * 1024),
        # v7x (64 MiB physical) or unknown chip: keep the footprint modest
        "small_vmem": dict(tm=512, tn=512, tk=1024, vmem_limit=48 * 1024 * 1024),
    }

    def __init__(self, weight, bias):
        weight = jnp.asarray(weight, dtype=jnp.float32)   # PyTorch layout [I, F]
        bias = jnp.asarray(bias, dtype=jnp.float32)
        self.num_item, self.num_feat = weight.shape
        I, F = self.num_item, self.num_feat

        # ---- pick the tile budget from the actual chip's VMEM capacity ----
        try:
            info = pltpu.get_tpu_info()
            vmem_bytes = int(getattr(info, "vmem_capacity_bytes", 64 * 1024 * 1024))
        except Exception:
            vmem_bytes = 64 * 1024 * 1024  # conservative (v7x-sized) default
        cfg = self._TILE_TABLE[
            "large_vmem" if vmem_bytes >= 100 * 1024 * 1024 else "small_vmem"
        ]
        self._tm_max = cfg["tm"]
        self._vmem_limit = cfg["vmem_limit"]

        # ---- tiny-layer fast path (single VMEM block, f32) ----
        self._tiny = (I <= 256) and (F <= 1024)
        if self._tiny:
            self._w_small = weight.T                 # one-time [F, I]
            self._b_small = bias.reshape(1, I)

        # ---- one-time tiled-path prep: transpose -> [F, I], pad, cast bf16 ----
        tn = min(cfg["tn"], _round_up(I, 128))
        tk = min(cfg["tk"], _round_up(F, 128))
        # v7x megacore: guarantee >= 2 blocks along the "parallel" N axis when
        # N allows it, so the second TensorCore has work even at small batch.
        if _round_up(I, tn) // tn == 1 and _round_up(I, 128) >= 256:
            tn = _round_up(_round_up(I, 128) // 2, 128)
        self._tn, self._tk = tn, tk
        i_pad = _round_up(I, tn)
        f_pad = _round_up(F, tk)
        self._i_pad, self._f_pad = i_pad, f_pad

        w_t = weight.T                                # [F, I], contraction on F
        self._w_tiled = jnp.pad(
            w_t, ((0, f_pad - F), (0, i_pad - I))
        ).astype(jnp.bfloat16)                        # bf16 weights, padded once
        self._b_tiled = jnp.pad(bias, (0, i_pad - I)).reshape(1, i_pad)  # f32

    # ------------------------------------------------------------------
    def __call__(self, x):
        x = jnp.asarray(x)
        B, F = x.shape
        assert F == self.num_feat, "feature dim of x must match the weight"
        if self._tiny and B <= 512:
            return self._forward_small(x)
        return self._forward_tiled(x)

    # ------------------------------------------------------------------
    def _forward_small(self, x):
        B, F = x.shape
        I = self.num_item
        return pl.pallas_call(
            _linear_kernel_small,
            out_shape=jax.ShapeDtypeStruct((B, I), x.dtype),
            grid=(1,),
            in_specs=[
                pl.BlockSpec((B, F), lambda i: (0, 0)),
                pl.BlockSpec((F, I), lambda i: (0, 0)),
                pl.BlockSpec((1, I), lambda i: (0, 0)),
            ],
            out_specs=pl.BlockSpec((B, I), lambda i: (0, 0)),
        )(x, self._w_small, self._b_small)

    # ------------------------------------------------------------------
    def _forward_tiled(self, x):
        B, F = x.shape
        I = self.num_item
        tn, tk = self._tn, self._tk
        i_pad, f_pad = self._i_pad, self._f_pad

        # bf16 activations -> M tile must be a multiple of 16 sublanes.
        tm = min(self._tm_max, _round_up(B, 16))
        b_pad = _round_up(B, tm)

        x_p = x
        if (b_pad, f_pad) != (B, F):
            x_p = jnp.pad(x, ((0, b_pad - B), (0, f_pad - F)))
        x_p = x_p.astype(jnp.bfloat16)        # bf16 operands, f32 accumulation

        grid = (b_pad // tm, i_pad // tn, f_pad // tk)
        out_dtype = x.dtype
        f32_out = out_dtype == jnp.float32
        kernel = _linear_kernel_f32_out if f32_out else _linear_kernel_acc
        scratch = [] if f32_out else [pltpu.VMEM((tm, tn), jnp.float32)]

        out_padded = pl.pallas_call(
            kernel,
            out_shape=jax.ShapeDtypeStruct((b_pad, i_pad), out_dtype),
            grid=grid,
            in_specs=[
                pl.BlockSpec((tm, tk), lambda i, j, k: (i, k)),  # x   (bf16)
                pl.BlockSpec((tk, tn), lambda i, j, k: (k, j)),  # W.T (bf16, [F,I])
                pl.BlockSpec((1, tn), lambda i, j, k: (0, j)),   # bias (f32)
            ],
            out_specs=pl.BlockSpec((tm, tn), lambda i, j, k: (i, j)),
            scratch_shapes=scratch,
            compiler_params=pltpu.CompilerParams(
                dimension_semantics=("parallel", "parallel", "arbitrary"),
                vmem_limit_bytes=self._vmem_limit,
            ),
        )(x_p, self._w_tiled, self._b_tiled)

        if (b_pad, i_pad) != (B, I):
            out_padded = out_padded[:B, :I]
        return out_padded


# --------------------------------------------------------------------------
if __name__ == "__main__":
    key = jax.random.PRNGKey(0)

    # ---- Test 1: tiny shapes matching the module spec (single-block path) ----
    batch, num_feat, num_item = 8, 32, 16
    k1, k2, k3, key = jax.random.split(key, 4)
    x = jax.random.normal(k1, (batch, num_feat), dtype=jnp.float32)
    bound = 1.0 / (num_feat ** 0.5)
    weight = jax.random.uniform(
        k2, (num_item, num_feat), minval=-bound, maxval=bound, dtype=jnp.float32
    )
    bias = jax.random.uniform(
        k3, (num_item,), minval=-bound, maxval=bound, dtype=jnp.float32
    )

    layer = PallasLinear(weight, bias)
    out = jax.block_until_ready(layer(x))
    ref = x @ weight.T + bias
    assert out.shape == (batch, num_item)
    assert jnp.allclose(out, ref, atol=1e-5, rtol=1e-5), "tiny-path mismatch"

    # ---- Test 2: larger shapes exercising the tiled bf16 MXU path ----
    B2, F2, I2 = 256, 1280, 384
    k4, k5, k6, key = jax.random.split(key, 4)
    x2 = jax.random.normal(k4, (B2, F2), dtype=jnp.float32)
    bound2 = 1.0 / (F2 ** 0.5)
    w2 = jax.random.uniform(
        k5, (I2, F2), minval=-bound2, maxval=bound2, dtype=jnp.float32
    )
    b2 = jax.random.uniform(
        k6, (I2,), minval=-bound2, maxval=bound2, dtype=jnp.float32
    )

    layer2 = PallasLinear(w2, b2)
    out2 = jax.block_until_ready(layer2(x2))
    ref2 = x2 @ w2.T + b2
    assert out2.shape == (B2, I2)
    # bf16 operands / f32 accumulation: compare against the f32 reference with
    # a documented, loosened tolerance.
    assert jnp.allclose(out2, ref2, atol=5e-2, rtol=5e-2), "tiled-path mismatch"

    print("KERNEL_OK")
</pallas_src>

<mosaic_0001>
module attributes {stable_mosaic.version = 11 : i64} {
  func.func @_linear_kernel_small(%arg0: i32, %arg1: memref<8x32xf32, #tpu.memory_space<vmem>>, %arg2: memref<32x16xf32, #tpu.memory_space<vmem>>, %arg3: memref<1x16xf32, #tpu.memory_space<vmem>>, %arg4: memref<8x16xf32, #tpu.memory_space<vmem>>) attributes {dimension_semantics = [#tpu.dimension_semantics<arbitrary>], iteration_bounds = array<i64: 1>, scalar_prefetch = 0 : i64, scratch_operands = 0 : i64, tpu.core_type = #tpu.core_type<tc>, window_params = [{pipeline_mode = #tpu.pipeline_mode<synchronous>, transform_indices = @transform_0, window_bounds = array<i64: 8, 32>}, {pipeline_mode = #tpu.pipeline_mode<synchronous>, transform_indices = @transform_1, window_bounds = array<i64: 32, 16>}, {pipeline_mode = #tpu.pipeline_mode<synchronous>, transform_indices = @transform_2, window_bounds = array<i64: 1, 16>}, {pipeline_mode = #tpu.pipeline_mode<synchronous>, transform_indices = @transform_3, window_bounds = array<i64: 8, 16>}]} {
    %c0 = arith.constant 0 : index
    %c0_0 = arith.constant 0 : index
    %0 = vector.load %arg1[%c0, %c0_0] : memref<8x32xf32, #tpu.memory_space<vmem>>, vector<8x32xf32>
    %c0_1 = arith.constant 0 : index
    %c0_2 = arith.constant 0 : index
    %1 = vector.load %arg2[%c0_1, %c0_2] : memref<32x16xf32, #tpu.memory_space<vmem>>, vector<32x16xf32>
    %cst = arith.constant dense<0.000000e+00> : vector<8x16xf32>
    %2 = tpu.matmul %0, %1, %cst {dimension_numbers = #tpu.dot_dimension_numbers<[1], [0], [0], [1], [0, 0, 1, 1], [], []>} : vector<8x32xf32>, vector<32x16xf32>, vector<8x16xf32> -> vector<8x16xf32>
    %c0_3 = arith.constant 0 : index
    %c0_4 = arith.constant 0 : index
    %3 = vector.load %arg3[%c0_3, %c0_4] : memref<1x16xf32, #tpu.memory_space<vmem>>, vector<1x16xf32>
    %4 = vector.broadcast %3 : vector<1x16xf32> to vector<8x16xf32>
    %5 = arith.addf %2, %4 : vector<8x16xf32>
    %c0_5 = arith.constant 0 : index
    %c0_6 = arith.constant 0 : index
    %6 = vector.load %arg4[%c0_5, %c0_6] : memref<8x16xf32, #tpu.memory_space<vmem>>, vector<8x16xf32>
    tpu.vector_store %arg4[%c0_5, %c0_6], %5 {strides = array<i32>} : memref<8x16xf32, #tpu.memory_space<vmem>>, vector<8x16xf32>,
    return
  }
  func.func @transform_0(%arg0: i32) -> (i32, i32) {
    %c0_i32 = arith.constant 0 : i32
    %c0_i32_0 = arith.constant 0 : i32
    %c0_i32_1 = arith.constant 0 : i32
    return %c0_i32, %c0_i32_0 : i32, i32
  }
  func.func @transform_1(%arg0: i32) -> (i32, i32) {
    %c0_i32 = arith.constant 0 : i32
    %c0_i32_0 = arith.constant 0 : i32
    %c0_i32_1 = arith.constant 0 : i32
    return %c0_i32, %c0_i32_0 : i32, i32
  }
  func.func @transform_2(%arg0: i32) -> (i32, i32) {
    %c0_i32 = arith.constant 0 : i32
    %c0_i32_0 = arith.constant 0 : i32
    %c0_i32_1 = arith.constant 0 : i32
    return %c0_i32, %c0_i32_0 : i32, i32
  }
  func.func @transform_3(%arg0: i32) -> (i32, i32) {
    %c0_i32 = arith.constant 0 : i32
    %c0_i32_0 = arith.constant 0 : i32
    %c0_i32_1 = arith.constant 0 : i32
    return %c0_i32, %c0_i32_0 : i32, i32
  }
}

</mosaic_0001>

<bundles_post_ra>
// kernel: tpu_custom_call.1
= control target key start
LH: loop header
LB: loop body
LE: loop exit
PB: predicated region body
PF: predicated region fallthrough
CT: control target
= control target key end

     0   :  { %v160_v1 = vmov 0.0   ;;  %vm161_vm0 = vmmov 0   ;;  %s204_s0 = inlined_call_operand.vmem [shape: f32[8,32], index: 0, kind: input, shape index: {}]   ;;  %s205_s1 = inlined_call_operand.vmem [shape: f32[32,16], index: 1, kind: input, shape index: {}]   ;;  %s206_s2 = inlined_call_operand.vmem [shape: f32[1,16], index: 2, kind: input, shape index: {}]   ;;  %s207_s3 = inlined_call_operand.hbm [shape: f32[8,16], index: 3, kind: output, shape index: {}]  }
   0x1   :  { %v19_v0 = vld [vmem:[%s205_s1 + $0x18] sm:$0xff]  ;;  %124 = vmatprep.subr.mxu0 %v160_v1  ;;  %v18_v2 = vld [vmem:[%s205_s1 + $0x10] sm:$0xff]  ;;  %132 = vmatprep.mubr.msk.f32.mxu0 %vm161_vm0, %v160_v1 }
   0x2   :  { %125 = vmatpush3.msra.mxu0 %v19_v0 }
   0x3   :  { %8 = vsyncpa [#allocation3], 0  ;;  %126 = vmatprep.subr.mxu0 %v160_v1  ;;  %v17_v3 = vld [vmem:[%s205_s1 + $0x8] sm:$0xff]  ;;  %v16_v4 = vld [vmem:[%s205_s1] sm:$0xff]  ;;  %vm27_vm1 = vcmask 261120   ;;  %s162_s24 = smov [#allocation2]  }
   0x4   :  { %127 = vmatpush3.msra.mxu0 %v18_v2  ;;  %v15_v5 = vld [vmem:[%s204_s0] sm:$0xff]  ;;  %s109_s25 = sshll.u32 %s162_s24, 4  ;;  %vm101_vm2 = vcmask 130048   ;;  %s110_s25 = int_to_ptr.vmem [resolvable:$true] %s109_s25 }
   0x5   :  { %128 = vmatprep.subr.mxu0 %v160_v1  ;;  %v117_v6 = vld [vmem:[%s206_s2] ss:$0 sm:$0xff]  ;;  %s138_s1 = scalar_lea.vmem %s110_s25, 128  ;;  %p143_p1 = scmp.lt.s32.totalorder %s110_s25, %s110_s25 }
   0x6   :  { %129 = vmatpush3.msra.mxu0 %v17_v3  ;;  %p139_p0 = scmp.ne.s32.totalorder %s110_s25, %s138_s1  ;;  %p144_p2 = scmp.lt.s32.totalorder %s138_s1, %s138_s1 }
   0x7   :  { %130 = vmatprep.subr.mxu0 %v160_v1 }
   0x8   :  { %131 = vmatpush3.msra.mxu0 %v16_v4  ;;  %p145_p3 = por %p144_p2, %p143_p1 }
   0x9   :  { %133 = vmatmul.mubr.msk.f32.vlgmr.msra.gmra.mxu0 %vm27_vm1, %v15_v5 }
   0xa   :  { %p146_p4 = pnand %p145_p3, %p139_p0 }
  0xc9   :  { %v97_v7 = vpop.f32.mrf.mxu0 }
  0xca   :  { %v98_v8 = vadd.f32 %v117_v6, %v97_v7 }
  0xcb   :  { %v134_v9 = vpop.f32.mrf.mxu0 }
  0xcc   :  { %102 = vst.msk [vmem:[#allocation2] sm:$0xff] %vm101_vm2, %v98_v8 }
  0xcd   :  { %149 = shalt.err (!%p146_p4)
}
  0xce   :  { %112 = dma.vmem_to_hbm [thread:$0]  %s110_s25, 128, %s207_s3, [#allocation3]  }
  0xcf   :  { %158 = dma.done.wait [#allocation3], 128  }
  0xd0   :  { %159 = vsyncadd [#allocation3], 4294967168 }
  0xd1   :  { %116 = vsyncpa [#allocation3], 1 }

</bundles_post_ra>
